<compile_context>
chip_gen: v7x
topology: tpu7x:2x2x1
jax: 0.10.0
libtpu: 0.0.40
codegen_flags: <defaults>
</compile_context>

<pallas_src>
import jax
import jax.numpy as jnp
from jax import lax
from jax.experimental import pallas as pl
from jax.experimental.pallas import tpu as pltpu


def _feature_aug_kernel(
    feat_ref,   # (1, C, T)   f32   channels-first feature tile
    pproj_ref,  # (1, P, C2)  bf16  precomputed prototype projection
    bias_ref,   # (1, P, 1)   f32   additive label mask (0 selected, -1e30 not)
    wf_ref,     # (C2, C)     bf16  feature_fc weight (channels-first)
    bf_ref,     # (C2, 1)     f32   feature_fc bias
    w3a_ref,    # (C2, C2)    bf16  fc3 weight half acting on prototype_aug
    w3b_ref,    # (C2, C2)    bf16  fc3 weight half acting on feature_proj
    b3_ref,     # (C2, 1)     f32   fc3 bias
    w4_ref,     # (C, C2)     bf16  fc4 weight (channels-first)
    b4_ref,     # (C, 1)      f32   fc4 bias
    out_ref,    # (1, C, T)   f32
):
    f32, bf16 = jnp.float32, jnp.bfloat16

    feat_bf = feat_ref[0].astype(bf16)            # (C, T)
    pp_bf = pproj_ref[0]                          # (P, C2) already bf16

    # feature_fc (channels-first): (C2, T)
    fproj = jnp.dot(wf_ref[...], feat_bf, preferred_element_type=f32) + bf_ref[...]
    fproj_bf = fproj.astype(bf16)

    # attention = softmax over prototypes (P on sublanes, space on lanes)
    logits = jnp.dot(pp_bf, fproj_bf, preferred_element_type=f32)     # (P, T)
    logits = logits + bias_ref[0]                 # unselected protos -> -1e30
    logits = logits - jnp.max(logits, axis=0, keepdims=True)
    e = jnp.exp(logits)
    # approx reciprocal uses the EUP slot (~free); ~1e-3 rel error vs exact
    # softmax, well inside the test tolerance.
    attn = e * pl.reciprocal(jnp.sum(e, axis=0, keepdims=True), approx=True)

    # prototype_aug = pproj^T @ attn, without materializing a transpose:
    # contract the prototype axis of BOTH operands (MXU-native).
    paug = lax.dot_general(pp_bf, attn.astype(bf16),
                           dimension_numbers=(((0,), (0,)), ((), ())),
                           preferred_element_type=f32)                # (C2, T)

    # fc3 on concat([prototype_aug, feature_proj]) == W3a @ paug + W3b @ fproj
    fagg = (jnp.dot(w3a_ref[...], paug.astype(bf16), preferred_element_type=f32)
            + jnp.dot(w3b_ref[...], fproj_bf, preferred_element_type=f32)
            + b3_ref[...])
    fagg = jnp.maximum(fagg, 0.0)                  # (C2, T)

    # out = relu(features + fc4(fagg)); re-read the f32 residual tile here so
    # its live range is short (avoids vreg spills at large C*T).
    out = feat_ref[0] + jnp.dot(w4_ref[...], fagg.astype(bf16),
                                preferred_element_type=f32) + b4_ref[...]
    out_ref[0] = jnp.maximum(out, 0.0).astype(out_ref.dtype)


def _vmem_limit_bytes():
    """Generation-aware scoped-VMEM limit (~25% headroom below physical)."""
    try:
        cap = int(pltpu.get_tpu_info().vmem_capacity_bytes)
    except Exception:
        cap = 64 * 1024 * 1024
    return max(32 * 1024 * 1024, (cap * 3) // 4)


def _choose_hw_tile(hw_pad, c, vmem_limit):
    """Largest lane-dense (multiple-of-128) spatial tile dividing hw_pad whose
    double-buffered f32 feature+output blocks stay well inside the budget."""
    for cand in (1024, 512, 256, 128):
        if hw_pad % cand != 0:
            continue
        if 2 * 2 * c * cand * 4 <= vmem_limit // 2:   # in+out, 2 buffers, f32
            return cand
    return 128


def init_params(key, dim):
    """Deterministic init matching the nn.Linear shapes (weights bf16, biases
    f32), stored in the channels-first orientation the kernel uses."""
    d2 = dim // 2
    ks = jax.random.split(key, 10)
    bf16 = jnp.bfloat16

    def u(k, shape, fan_in):
        return jax.random.uniform(k, shape, jnp.float32, -1.0, 1.0) / jnp.sqrt(
            jnp.float32(fan_in))

    return dict(
        wp=u(ks[0], (dim, d2), dim).astype(bf16),     # prototype_fc (wrapper)
        bp=u(ks[1], (1, d2), dim),
        wf_t=u(ks[2], (d2, dim), dim).astype(bf16),   # feature_fc (transposed)
        bf_t=u(ks[3], (d2, 1), dim),
        w3a_t=u(ks[4], (d2, d2), dim).astype(bf16),   # fc3, prototype_aug half
        w3b_t=u(ks[5], (d2, d2), dim).astype(bf16),   # fc3, feature_proj half
        b3_t=u(ks[6], (d2, 1), dim),
        w4_t=u(ks[7], (dim, d2), d2).astype(bf16),    # fc4 (transposed)
        b4_t=u(ks[8], (dim, 1), d2),
    )


@jax.jit
def feature_aug_forward(x, prototypes, labels, params):
    """x: (N, C, H, W) f32; prototypes: (N, P, C) f32; labels: (N, P) {0,1}.
    Requires >=1 selected prototype per sample (same invariant as the PyTorch
    nonzero/gather path — otherwise softmax degenerates to uniform instead of
    erroring)."""
    N, C, H, W = x.shape
    P = prototypes.shape[1]
    C2 = C // 2
    HW = H * W
    HW_pad = -(-HW // 128) * 128            # lane-dense stores for any H*W
    vmem_limit = _vmem_limit_bytes()
    T = _choose_hw_tile(HW_pad, C, vmem_limit)

    feats = x.reshape(N, C, HW)             # channels-first: free reshape
    if HW_pad != HW:
        feats = jnp.pad(feats, ((0, 0), (0, 0), (0, HW_pad - HW)))

    # Additive attention bias: 0 for selected prototypes, -1e30 otherwise.
    bias = (labels.astype(jnp.float32) - 1.0)[..., None] * 1e30       # (N,P,1)

    # Loop-invariant prototype projection hoisted out of the spatial grid loop:
    # one small XLA matmul instead of HW_pad/T repeats inside the kernel.
    pproj = (jnp.matmul(prototypes.astype(jnp.bfloat16), params["wp"],
                        preferred_element_type=jnp.float32) + params["bp"])
    pproj_bf = pproj.astype(jnp.bfloat16)                              # (N,P,C2)

    # Grid-invariant weights: single-buffer them when they are VMEM-heavy
    # (v7x has only 64 MiB VMEM); keep default double-buffering otherwise.
    single_buffer = C >= 512

    def const_spec(arr):
        idx = lambda i, j: (0,) * arr.ndim
        if single_buffer:
            return pl.BlockSpec(arr.shape, idx, pipeline_mode=pl.Buffered(1))
        return pl.BlockSpec(arr.shape, idx)

    flops = int(N * HW_pad * (2 * C * C2 + 4 * P * C2 + 4 * C2 * C2 + 2 * C2 * C))
    transcendentals = int(N * HW_pad * (P + 1))
    bytes_accessed = int(
        4 * (2 * N * HW_pad * C + N * P) + 2 * N * P * C2
        + 2 * (C2 * C + 2 * C2 * C2 + C * C2) + 4 * (2 * C2 + C))

    out = pl.pallas_call(
        _feature_aug_kernel,
        out_shape=jax.ShapeDtypeStruct((N, C, HW_pad), jnp.float32),
        grid_spec=pltpu.PrefetchScalarGridSpec(
            num_scalar_prefetch=0,
            grid=(N, HW_pad // T),
            in_specs=[
                pl.BlockSpec((1, C, T), lambda i, j: (i, 0, j)),     # features
                pl.BlockSpec((1, P, C2), lambda i, j: (i, 0, 0)),    # proto proj
                pl.BlockSpec((1, P, 1), lambda i, j: (i, 0, 0)),     # mask bias
                const_spec(params["wf_t"]), const_spec(params["bf_t"]),
                const_spec(params["w3a_t"]), const_spec(params["w3b_t"]),
                const_spec(params["b3_t"]),
                const_spec(params["w4_t"]), const_spec(params["b4_t"]),
            ],
            out_specs=pl.BlockSpec((1, C, T), lambda i, j: (i, 0, j)),
        ),
        compiler_params=pltpu.CompilerParams(
            dimension_semantics=("parallel", "parallel"),
            vmem_limit_bytes=vmem_limit,
        ),
        cost_estimate=pl.CostEstimate(
            flops=flops,
            transcendentals=transcendentals,
            bytes_accessed=bytes_accessed,
        ),
    )(
        feats, pproj_bf, bias,
        params["wf_t"], params["bf_t"],
        params["w3a_t"], params["w3b_t"], params["b3_t"],
        params["w4_t"], params["b4_t"],
    )

    return out[:, :, :HW].reshape(N, C, H, W)


def _reference_forward(x, prototypes, labels, params):
    """Pure-JAX reference mirroring the kernel's bf16-operand / f32-accum math."""
    N, C, H, W = x.shape
    bf16, f32 = jnp.bfloat16, jnp.float32

    def mm(a, b):
        return jnp.matmul(a.astype(bf16), b.astype(bf16),
                          preferred_element_type=f32)

    feats = jnp.transpose(x, (0, 2, 3, 1)).reshape(N, H * W, C)       # (N,HW,C)
    bias = (labels.astype(f32) - 1.0)[:, None, :] * 1e30              # (N,1,P)

    pproj = mm(prototypes, params["wp"]) + params["bp"]               # (N,P,C2)
    fproj = mm(feats, params["wf_t"].T) + params["bf_t"].T            # (N,HW,C2)
    logits = mm(fproj, jnp.swapaxes(pproj, -1, -2)) + bias            # (N,HW,P)
    attn = jax.nn.softmax(logits, axis=-1)
    paug = mm(attn, pproj)                                            # (N,HW,C2)
    fagg = jnp.maximum(
        mm(paug, params["w3a_t"].T) + mm(fproj, params["w3b_t"].T)
        + params["b3_t"].T, 0.0)
    out = jnp.maximum(feats + mm(fagg, params["w4_t"].T) + params["b4_t"].T, 0.0)
    return jnp.transpose(out.reshape(N, H, W, C), (0, 3, 1, 2))


if __name__ == "__main__":
    key = jax.random.PRNGKey(0)
    kx, kp, kl, kw, kx2, kp2, kl2 = jax.random.split(key, 7)

    C, P = 32, 8
    params = init_params(kw, C)

    def run_case(k_x, k_p, k_l, N, H, W):
        x = jax.random.normal(k_x, (N, C, H, W), jnp.float32)
        prototypes = jax.random.normal(k_p, (N, P, C), jnp.float32)
        labels = (jax.random.uniform(k_l, (N, P)) > 0.5).astype(jnp.int32)
        labels = labels.at[:, 0].set(1)   # >=1 selected prototype per sample
        out = jax.block_until_ready(
            feature_aug_forward(x, prototypes, labels, params))
        ref = _reference_forward(x, prototypes, labels, params)
        assert out.shape == (N, C, H, W)
        err = float(jnp.max(jnp.abs(out - ref)))
        assert jnp.allclose(out, ref, atol=2e-2, rtol=2e-2), err

    run_case(kx, kp, kl, N=2, H=16, W=16)      # H*W = 256 (already lane-dense)
    run_case(kx2, kp2, kl2, N=2, H=14, W=14)   # H*W = 196 -> exercises padding

    print("KERNEL_OK")
</pallas_src>

<mosaic_0001>
module attributes {stable_mosaic.version = 11 : i64} {
  func.func @_feature_aug_kernel(%arg0: i32, %arg1: i32, %arg2: memref<1x32x256xf32, #tpu.memory_space<vmem>>, %arg3: memref<1x8x16xbf16, #tpu.memory_space<vmem>>, %arg4: memref<1x8x1xf32, #tpu.memory_space<vmem>>, %arg5: memref<16x32xbf16, #tpu.memory_space<vmem>>, %arg6: memref<16x1xf32, #tpu.memory_space<vmem>>, %arg7: memref<16x16xbf16, #tpu.memory_space<vmem>>, %arg8: memref<16x16xbf16, #tpu.memory_space<vmem>>, %arg9: memref<16x1xf32, #tpu.memory_space<vmem>>, %arg10: memref<32x16xbf16, #tpu.memory_space<vmem>>, %arg11: memref<32x1xf32, #tpu.memory_space<vmem>>, %arg12: memref<1x32x256xf32, #tpu.memory_space<vmem>>) attributes {dimension_semantics = [#tpu.dimension_semantics<parallel>, #tpu.dimension_semantics<parallel>], iteration_bounds = array<i64: 2, 1>, scalar_prefetch = 0 : i64, scratch_operands = 0 : i64, tpu.core_type = #tpu.core_type<tc>, window_params = [{transform_indices = @transform_0, window_bounds = array<i64: 1, 32, 256>}, {transform_indices = @transform_1, window_bounds = array<i64: 1, 8, 16>}, {transform_indices = @transform_2, window_bounds = array<i64: 1, 8, 1>}, {pipeline_mode = #tpu.pipeline_mode<synchronous>, transform_indices = @transform_3, window_bounds = array<i64: 16, 32>}, {pipeline_mode = #tpu.pipeline_mode<synchronous>, transform_indices = @transform_4, window_bounds = array<i64: 16, 1>}, {pipeline_mode = #tpu.pipeline_mode<synchronous>, transform_indices = @transform_5, window_bounds = array<i64: 16, 16>}, {pipeline_mode = #tpu.pipeline_mode<synchronous>, transform_indices = @transform_6, window_bounds = array<i64: 16, 16>}, {pipeline_mode = #tpu.pipeline_mode<synchronous>, transform_indices = @transform_7, window_bounds = array<i64: 16, 1>}, {pipeline_mode = #tpu.pipeline_mode<synchronous>, transform_indices = @transform_8, window_bounds = array<i64: 32, 16>}, {pipeline_mode = #tpu.pipeline_mode<synchronous>, transform_indices = @transform_9, window_bounds = array<i64: 32, 1>}, {transform_indices = @transform_10, window_bounds = array<i64: 1, 32, 256>}]} {
    %c0 = arith.constant 0 : index
    %c0_0 = arith.constant 0 : index
    %c0_1 = arith.constant 0 : index
    %0 = vector.load %arg2[%c0, %c0_0, %c0_1] : memref<1x32x256xf32, #tpu.memory_space<vmem>>, vector<1x32x256xf32>
    %1 = vector.shape_cast %0 : vector<1x32x256xf32> to vector<32x256xf32>
    %2 = arith.truncf %1 : vector<32x256xf32> to vector<32x256xbf16>
    %c0_2 = arith.constant 0 : index
    %c0_3 = arith.constant 0 : index
    %c0_4 = arith.constant 0 : index
    %3 = vector.load %arg3[%c0_2, %c0_3, %c0_4] : memref<1x8x16xbf16, #tpu.memory_space<vmem>>, vector<1x8x16xbf16>
    %4 = vector.shape_cast %3 : vector<1x8x16xbf16> to vector<8x16xbf16>
    %c0_5 = arith.constant 0 : index
    %c0_6 = arith.constant 0 : index
    %5 = vector.load %arg5[%c0_5, %c0_6] : memref<16x32xbf16, #tpu.memory_space<vmem>>, vector<16x32xbf16>
    %cst = arith.constant dense<0.000000e+00> : vector<16x256xf32>
    %6 = tpu.matmul %5, %2, %cst {dimension_numbers = #tpu.dot_dimension_numbers<[1], [0], [0], [1], [0, 0, 1, 1], [], []>} : vector<16x32xbf16>, vector<32x256xbf16>, vector<16x256xf32> -> vector<16x256xf32>
    %c0_7 = arith.constant 0 : index
    %c0_8 = arith.constant 0 : index
    %7 = vector.load %arg6[%c0_7, %c0_8] : memref<16x1xf32, #tpu.memory_space<vmem>>, vector<16x1xf32>
    %8 = vector.broadcast %7 : vector<16x1xf32> to vector<16x256xf32>
    %9 = arith.addf %6, %8 : vector<16x256xf32>
    %10 = arith.truncf %9 : vector<16x256xf32> to vector<16x256xbf16>
    %cst_9 = arith.constant dense<0.000000e+00> : vector<8x256xf32>
    %11 = tpu.matmul %4, %10, %cst_9 {dimension_numbers = #tpu.dot_dimension_numbers<[1], [0], [0], [1], [0, 0, 1, 1], [], []>} : vector<8x16xbf16>, vector<16x256xbf16>, vector<8x256xf32> -> vector<8x256xf32>
    %c0_10 = arith.constant 0 : index
    %c0_11 = arith.constant 0 : index
    %c0_12 = arith.constant 0 : index
    %12 = vector.load %arg4[%c0_10, %c0_11, %c0_12] : memref<1x8x1xf32, #tpu.memory_space<vmem>>, vector<1x8x1xf32>
    %13 = vector.shape_cast %12 : vector<1x8x1xf32> to vector<8x1xf32>
    %14 = vector.broadcast %13 : vector<8x1xf32> to vector<8x256xf32>
    %15 = arith.addf %11, %14 : vector<8x256xf32>
    %cst_13 = arith.constant dense<0xFF800000> : vector<256xf32>
    %16 = vector.multi_reduction <maximumf>, %15, %cst_13 [0] : vector<8x256xf32> to vector<256xf32>
    %17 = vector.shape_cast %16 : vector<256xf32> to vector<1x256xf32>
    %18 = vector.broadcast %17 : vector<1x256xf32> to vector<8x256xf32>
    %19 = arith.subf %15, %18 : vector<8x256xf32>
    %20 = math.exp %19 : vector<8x256xf32>
    %cst_14 = arith.constant dense<0.000000e+00> : vector<256xf32>
    %21 = vector.multi_reduction <add>, %20, %cst_14 [0] : vector<8x256xf32> to vector<256xf32>
    %22 = vector.shape_cast %21 : vector<256xf32> to vector<1x256xf32>
    %23 = tpu.reciprocal %22 {approx = true} : vector<1x256xf32> -> vector<1x256xf32>
    %24 = vector.broadcast %23 : vector<1x256xf32> to vector<8x256xf32>
    %25 = arith.mulf %20, %24 : vector<8x256xf32>
    %26 = arith.truncf %25 : vector<8x256xf32> to vector<8x256xbf16>
    %cst_15 = arith.constant dense<0.000000e+00> : vector<16x256xf32>
    %27 = tpu.matmul %4, %26, %cst_15 {dimension_numbers = #tpu.dot_dimension_numbers<[0], [0], [1], [1], [0, 1, 1, 1], [], []>} : vector<8x16xbf16>, vector<8x256xbf16>, vector<16x256xf32> -> vector<16x256xf32>
    %c0_16 = arith.constant 0 : index
    %c0_17 = arith.constant 0 : index
    %28 = vector.load %arg7[%c0_16, %c0_17] : memref<16x16xbf16, #tpu.memory_space<vmem>>, vector<16x16xbf16>
    %29 = arith.truncf %27 : vector<16x256xf32> to vector<16x256xbf16>
    %cst_18 = arith.constant dense<0.000000e+00> : vector<16x256xf32>
    %30 = tpu.matmul %28, %29, %cst_18 {dimension_numbers = #tpu.dot_dimension_numbers<[1], [0], [0], [1], [0, 0, 1, 1], [], []>} : vector<16x16xbf16>, vector<16x256xbf16>, vector<16x256xf32> -> vector<16x256xf32>
    %c0_19 = arith.constant 0 : index
    %c0_20 = arith.constant 0 : index
    %31 = vector.load %arg8[%c0_19, %c0_20] : memref<16x16xbf16, #tpu.memory_space<vmem>>, vector<16x16xbf16>
    %cst_21 = arith.constant dense<0.000000e+00> : vector<16x256xf32>
    %32 = tpu.matmul %31, %10, %cst_21 {dimension_numbers = #tpu.dot_dimension_numbers<[1], [0], [0], [1], [0, 0, 1, 1], [], []>} : vector<16x16xbf16>, vector<16x256xbf16>, vector<16x256xf32> -> vector<16x256xf32>
    %33 = arith.addf %30, %32 : vector<16x256xf32>
    %c0_22 = arith.constant 0 : index
    %c0_23 = arith.constant 0 : index
    %34 = vector.load %arg9[%c0_22, %c0_23] : memref<16x1xf32, #tpu.memory_space<vmem>>, vector<16x1xf32>
    %35 = vector.broadcast %34 : vector<16x1xf32> to vector<16x256xf32>
    %36 = arith.addf %33, %35 : vector<16x256xf32>
    %cst_24 = arith.constant 0.000000e+00 : f32
    %37 = vector.broadcast %cst_24 : f32 to vector<16x256xf32>
    %38 = arith.maximumf %36, %37 : vector<16x256xf32>
    %c0_25 = arith.constant 0 : index
    %c0_26 = arith.constant 0 : index
    %c0_27 = arith.constant 0 : index
    %39 = vector.load %arg2[%c0_25, %c0_26, %c0_27] : memref<1x32x256xf32, #tpu.memory_space<vmem>>, vector<1x32x256xf32>
    %40 = vector.shape_cast %39 : vector<1x32x256xf32> to vector<32x256xf32>
    %c0_28 = arith.constant 0 : index
    %c0_29 = arith.constant 0 : index
    %41 = vector.load %arg10[%c0_28, %c0_29] : memref<32x16xbf16, #tpu.memory_space<vmem>>, vector<32x16xbf16>
    %42 = arith.truncf %38 : vector<16x256xf32> to vector<16x256xbf16>
    %cst_30 = arith.constant dense<0.000000e+00> : vector<32x256xf32>
    %43 = tpu.matmul %41, %42, %cst_30 {dimension_numbers = #tpu.dot_dimension_numbers<[1], [0], [0], [1], [0, 0, 1, 1], [], []>} : vector<32x16xbf16>, vector<16x256xbf16>, vector<32x256xf32> -> vector<32x256xf32>
    %44 = arith.addf %40, %43 : vector<32x256xf32>
    %c0_31 = arith.constant 0 : index
    %c0_32 = arith.constant 0 : index
    %45 = vector.load %arg11[%c0_31, %c0_32] : memref<32x1xf32, #tpu.memory_space<vmem>>, vector<32x1xf32>
    %46 = vector.broadcast %45 : vector<32x1xf32> to vector<32x256xf32>
    %47 = arith.addf %44, %46 : vector<32x256xf32>
    %cst_33 = arith.constant 0.000000e+00 : f32
    %48 = vector.broadcast %cst_33 : f32 to vector<32x256xf32>
    %49 = arith.maximumf %47, %48 : vector<32x256xf32>
    %c0_34 = arith.constant 0 : index
    %c0_35 = arith.constant 0 : index
    %c0_36 = arith.constant 0 : index
    %50 = vector.load %arg12[%c0_34, %c0_35, %c0_36] : memref<1x32x256xf32, #tpu.memory_space<vmem>>, vector<1x32x256xf32>
    %51 = vector.shape_cast %50 : vector<1x32x256xf32> to vector<32x256xf32>
    %52 = vector.shape_cast %49 : vector<32x256xf32> to vector<1x32x256xf32>
    tpu.vector_store %arg12[%c0_34, %c0_35, %c0_36], %52 {strides = array<i32>} : memref<1x32x256xf32, #tpu.memory_space<vmem>>, vector<1x32x256xf32>,
    return
  }
  func.func @transform_0(%arg0: i32, %arg1: i32) -> (i32, i32, i32) {
    %c0_i32 = arith.constant 0 : i32
    %c0_i32_0 = arith.constant 0 : i32
    return %arg0, %c0_i32, %arg1 : i32, i32, i32
  }
  func.func @transform_1(%arg0: i32, %arg1: i32) -> (i32, i32, i32) {
    %c0_i32 = arith.constant 0 : i32
    %c0_i32_0 = arith.constant 0 : i32
    %c0_i32_1 = arith.constant 0 : i32
    return %arg0, %c0_i32, %c0_i32_0 : i32, i32, i32
  }
  func.func @transform_2(%arg0: i32, %arg1: i32) -> (i32, i32, i32) {
    %c0_i32 = arith.constant 0 : i32
    %c0_i32_0 = arith.constant 0 : i32
    %c0_i32_1 = arith.constant 0 : i32
    return %arg0, %c0_i32, %c0_i32_0 : i32, i32, i32
  }
  func.func @transform_3(%arg0: i32, %arg1: i32) -> (i32, i32) {
    %c0_i32 = arith.constant 0 : i32
    %c0_i32_0 = arith.constant 0 : i32
    %c0_i32_1 = arith.constant 0 : i32
    return %c0_i32, %c0_i32_0 : i32, i32
  }
  func.func @transform_4(%arg0: i32, %arg1: i32) -> (i32, i32) {
    %c0_i32 = arith.constant 0 : i32
    %c0_i32_0 = arith.constant 0 : i32
    %c0_i32_1 = arith.constant 0 : i32
    return %c0_i32, %c0_i32_0 : i32, i32
  }
  func.func @transform_5(%arg0: i32, %arg1: i32) -> (i32, i32) {
    %c0_i32 = arith.constant 0 : i32
    %c0_i32_0 = arith.constant 0 : i32
    %c0_i32_1 = arith.constant 0 : i32
    return %c0_i32, %c0_i32_0 : i32, i32
  }
  func.func @transform_6(%arg0: i32, %arg1: i32) -> (i32, i32) {
    %c0_i32 = arith.constant 0 : i32
    %c0_i32_0 = arith.constant 0 : i32
    %c0_i32_1 = arith.constant 0 : i32
    return %c0_i32, %c0_i32_0 : i32, i32
  }
  func.func @transform_7(%arg0: i32, %arg1: i32) -> (i32, i32) {
    %c0_i32 = arith.constant 0 : i32
    %c0_i32_0 = arith.constant 0 : i32
    %c0_i32_1 = arith.constant 0 : i32
    return %c0_i32, %c0_i32_0 : i32, i32
  }
  func.func @transform_8(%arg0: i32, %arg1: i32) -> (i32, i32) {
    %c0_i32 = arith.constant 0 : i32
    %c0_i32_0 = arith.constant 0 : i32
    %c0_i32_1 = arith.constant 0 : i32
    return %c0_i32, %c0_i32_0 : i32, i32
  }
  func.func @transform_9(%arg0: i32, %arg1: i32) -> (i32, i32) {
    %c0_i32 = arith.constant 0 : i32
    %c0_i32_0 = arith.constant 0 : i32
    %c0_i32_1 = arith.constant 0 : i32
    return %c0_i32, %c0_i32_0 : i32, i32
  }
  func.func @transform_10(%arg0: i32, %arg1: i32) -> (i32, i32, i32) {
    %c0_i32 = arith.constant 0 : i32
    %c0_i32_0 = arith.constant 0 : i32
    return %arg0, %c0_i32, %arg1 : i32, i32, i32
  }
}

</mosaic_0001>

<bundles_post_ra>
// kernel: feature_aug_forward.1
= control target key start
LH: loop header
LB: loop body
LE: loop exit
PB: predicated region body
PF: predicated region fallthrough
CT: control target
= control target key end

     0   :  { %s1194_s13 = smov 0   ;;  %s1196_s14 = smov 0   ;;  %s1337_s0 = inlined_call_operand.vmem [shape: f32[2,32,256], index: 0, kind: input, shape index: {}]   ;;  %s1338_s1 = inlined_call_operand.vmem [shape: bf16[2,8,16], index: 1, kind: input, shape index: {}]   ;;  %s1339_s2 = inlined_call_operand.vmem [shape: f32[2,8,1], index: 2, kind: input, shape index: {}]   ;;  %s1340_s3 = inlined_call_operand.vmem [shape: bf16[16,32], index: 3, kind: input, shape index: {}]   ;;  %s1341_s4 = inlined_call_operand.vmem [shape: f32[16,1], index: 4, kind: input, shape index: {}]   ;;  %s1342_s5 = inlined_call_operand.vmem [shape: bf16[16,16], index: 5, kind: input, shape index: {}]   ;;  %s1343_s6 = inlined_call_operand.vmem [shape: bf16[16,16], index: 6, kind: input, shape index: {}]   ;;  %s1344_s7 = inlined_call_operand.vmem [shape: f32[16,1], index: 7, kind: input, shape index: {}]   ;;  %s1345_s8 = inlined_call_operand.vmem [shape: bf16[32,16], index: 8, kind: input, shape index: {}]   ;;  %s1346_s9 = inlined_call_operand.vmem [shape: f32[32,1], index: 9, kind: input, shape index: {}]   ;;  %s1347_s10 = inlined_call_operand.vmem [shape: f32[2,32,256], index: 10, kind: output, shape index: {}]  }
   0x1   :  { %s1198_s15 = smov 0  }
   0x2 LB: > { %s32_s16 = sadd.s32 1, %s1132_s14  ;;  %p1046_p0 = scmp.ge.s32.totalorder %s1136_s15, 1  ;;  %s1136_s15 = sphi %s1198_s15, %s20_s15   ;;  %s1132_s14 = sphi %s1196_s14, %s1349_s14   ;;  %s1128_s13 = sphi %s1194_s13, %s1348_s13  }
   0x3   : > { %p34_p1 = scmp.ge.s32.totalorder %s32_s16, 2  ;;  %p351_p2 = scmp.lt.s32.totalorder %s1136_s15, 3 }
   0x5   : > { %s1351_s16 = smov (%p34_p1, %s32_s16), 0  ;;  %p352_p3 = pnand %p1046_p0, %p351_p2 }
   0x6   : > { %p406_p4 = scmp.lt.s32.totalorder (!%p352_p3), %s1128_s13, 1  ;;  %v1138_v0 = vmov (!%p352_p3), 0   ;;  %v449_v1 = vld [vmem:[%s1341_s4] sm:$0xff] (!%p352_p3)  ;;  %v450_v2 = vld [vmem:[%s1341_s4 + $0x8] sm:$0xff] (!%p352_p3)  ;;  %vm466_vm0 = vcmask (!%p352_p3), 261120   ;;  %v885_v20 = vld [vmem:[%s1346_s9 + $0x10] sm:$0xff] (!%p352_p3) }
   0x7   : > { %355 = sbr.rel (%p352_p3) target bundleno = 1200 (0x4b0), region = 60  ;;  %502 = vmatprep.mubr.bf16.mxu0 (!%p352_p3), %v1138_v0  ;;  %1099 = vset.pattern.permute.xlu0 (!%p352_p3), %v1138_v0  ;;  %v780_v3 = vld [vmem:[%s1344_s7] sm:$0xff] (!%p352_p3)  ;;  %v781_v16 = vld [vmem:[%s1344_s7 + $0x8] sm:$0xff] (!%p352_p3)  ;;  %v886_v21 = vld [vmem:[%s1346_s9 + $0x18] sm:$0xff] (!%p352_p3)  ;;  %vm521_vm1 = vcmask (!%p352_p3), 130048   ;;  %vm622_vm2 = vcmask (!%p352_p3), 1043456  }
   0x8   : > { %453 = vperm.xlu0 (!%p352_p3), %1099, %v449_v1   ;;  %557 = vmatprep.mubr.bf16.mxu1 (!%p352_p3), %v1138_v0  ;;  %v1101_v17 = vld [vmem:[%s1340_s3] sm:$0xff] (!%p352_p3)   ;;  %v884_v19 = vld [vmem:[%s1346_s9 + $0x8] sm:$0xff] (!%p352_p3)  ;;  %vm618_vm3 = vcmask (!%p352_p3), 64512  }
   0x9   : > { %1100 = vset.pattern.permute.xlu1 (!%p352_p3), %v1138_v0  ;;  %v883_v18 = vld [vmem:[%s1346_s9] sm:$0xff] (!%p352_p3) }
   0xa   : > { %v1102_v36 = vld [vmem:[%s1343_s6] sm:$0xff] (!%p352_p3)  }
   0xc   : > { %458 = vperm.xlu0 (!%p352_p3), %1099, %v450_v2  }
   0xe   : > { %s1353_s13 = smov (!%p406_p4, %s1128_s13), 1 }
   0xf   : > { %s1068_s21 = sshll.u32 %s1353_s13, 6  ;;  %s1049_s28 = sshll.u32 %s1353_s13, 2 }
  0x10   : > { %s413_s24 = scalar_lea.vmem %s1337_s0, %s1068_s21  ;;  %784 = vperm.xlu0 %1099, %v780_v3   ;;  %s418_s11 = scalar_lea.vmem %s1338_s1, %s1049_s28 }
  0x11   : > { %v1233_v4 = vld [vmem:[%s413_s24 + $0x8] sm:$0xff]  ;;  %v1235_v5 = vld [vmem:[%s413_s24 + $0x18] sm:$0xff]  ;;  %v1237_v6 = vld [vmem:[%s413_s24] sm:$0xff] }
  0x12   : > { %v443_v7 = vpack.c.bf16 %v1235_v5, %v1233_v4  ;;  %v1241_v8 = vld [vmem:[%s413_s24 + $0x10] sm:$0xff]  ;;  %v1243_v9 = vld [vmem:[%s413_s24 + $0x28] sm:$0xff]  ;;  %v1245_v10 = vld [vmem:[%s413_s24 + $0x38] sm:$0xff] }
  0x13   : > { %v442_v11 = vpack.c.bf16 %v1241_v8, %v1237_v6  ;;  %v445_v12 = vpack.c.bf16 %v1245_v10, %v1243_v9  ;;  %v1251_v13 = vld [vmem:[%s413_s24 + $0x20] sm:$0xff]  ;;  %v1253_v14 = vld [vmem:[%s413_s24 + $0x30] sm:$0xff]  ;;  %s1050_s24 = sshll.u32 %s1353_s13, 3 }
  0x14   : > { %470 = vmatprep.subr.bf16.mxu0 %v443_v7  ;;  %v444_v15 = vpack.c.bf16 %v1253_v14, %v1251_v13  ;;  %789 = vperm.xlu0 %1099, %v781_v16   ;;  %s422_s27 = scalar_lea.vmem %s1339_s2, %s1050_s24  ;;  %v446_v23 = vld [vmem:[%s418_s11] sm:$0xf] }
  0x15   : > { %471 = vmatpush1.bf16.msra.mxu0 %v442_v11  ;;  %v515_v22 = vld [vmem:[%s422_s27] sm:$0xff]  ;;  %s1313_s27 = scalar_lea.vmem %s1347_s10, %s1068_s21 }
  0x16   : > { %472 = vmatprep.subr.bf16.mxu0 %v445_v12  ;;  %518 = vperm.xlu1 %1100, %v515_v22  }
  0x18   : > { %889 = vperm.xlu0 %1099, %v883_v18  }
  0x19   : > { %473 = vmatpush1.bf16.msra.mxu0 %v444_v15 }
  0x1c   : > { %1054 = vmatmul.mubr.msk.bf16.vlgmr.msra.gmra.mrb[0].mxu0 %vm466_vm0, %v1101_v17  ;;  %894 = vperm.xlu0 %1099, %v884_v19  }
  0x1d   : > { %718 = vmatprep.mubr.bf16.mxu0 %v1138_v0 }
  0x20   : > { %899 = vperm.xlu0 %1099, %v885_v20  }
  0x24   : > { %904 = vperm.xlu0 %1099, %v886_v21  }
  0x39   : > { %602 = vxpose.xlu1.c.b16.start.end [1/1] (short) (narrow) %v446_v23, 16 }
  0x87   : > { %v454_v24 = vpop.permute.xlu0 %453 }
  0x8b   : > { %v459_v27 = vpop.permute.xlu0 %458 }
  0x95   : > { %v519_v37 = vpop.permute.xlu1 %518 }
  0xef   : > { %v504_v25 = vpop.f32.mrb[0].mxu0 }
  0xf0   : > { %v506_v26 = vpop.f32.mrb[1].mxu0  ;;  %v505_v29 = vadd.f32 %v504_v25, %v454_v24 }
  0xf1   : > { %v508_v28 = vpop.f32.mrb[2].mxu0  ;;  %v507_v32 = vadd.f32 %v506_v26, %v454_v24  ;;  %v610_v26 = vpop.trf.xlu1 }
  0xf2   : > { %v509_v30 = vadd.f32 %v508_v28, %v459_v27  ;;  %v510_v31 = vpop.f32.mrb[3].mxu0 }
  0xf3   : > { %v511_v33 = vadd.f32 %v510_v31, %v459_v27 }
  0xf4   : > { %v513_v34 = vpack.c.bf16 %v509_v30, %v505_v29 }
  0xf5   : > { %v514_v35 = vpack.c.bf16 %v511_v33, %v507_v32  ;;  %v1103_v33 = vld [vmem:[%s1342_s5] sm:$0xff]  }
  0xf7   : > { %525 = vmatprep.subr.bf16.mxu1 %v514_v35  ;;  %686 = vmatprep.subr.bf16.mxu0 %v514_v35 }
  0xf8   : > { %526 = vmatpush1.bf16.msra.mxu1 %v513_v34  ;;  %687 = vmatpush1.bf16.msra.mxu0 %v513_v34  ;;  %v785_v34 = vpop.permute.xlu0 %784 }
  0xfb   : > { %1055 = vmatmul.mubr.msk.bf16.vlgmr.msra.gmra.mrb[0].mxu1 %vm521_vm1, %v446_v23  ;;  %1059 = vmatmul.mubr.msk.bf16.vlgmr.msra.gmra.mrb[4].mxu0 %vm521_vm1, %v1102_v36 }
  0xfc   : > { %661 = vmatprep.mubr.bf16.mxu1 %v1138_v0  ;;  %769 = vmatprep.mubr.bf16.mxu0 %v1138_v0 }
 0x1ce   : > { %v559_v38 = vpop.f32.mrb[0].mxu1 }
 0x1cf   : > { %v560_v39 = vadd.f32 %v559_v38, %v519_v37  ;;  %v561_v40 = vpop.f32.mrb[1].mxu1  ;;  %v790_v38 = vpop.permute.xlu0 %789 }
 0x1d0   : > { %v562_v41 = vadd.f32 %v561_v40, %v519_v37  ;;  %v563_v42 = vpop.f32.mrb[2].mxu1 }
 0x1d1   : > { %v566_v43 = vrot.slane %v560_v39, 4  ;;  %v564_v44 = vpop.f32.mrb[3].mxu1 }
 0x1d2   : > { %v572_v45 = vrot.slane %v562_v41, 4 }
 0x1d3   : > { %v567_v46 = vmax.f32 %v560_v39, %v566_v43 }
 0x1d4   : > { %v573_v47 = vmax.f32 %v562_v41, %v572_v45 }
 0x1d5   : > { %v568_v48 = vrot.slane %v567_v46, 2 }
 0x1d6   : > { %v574_v49 = vrot.slane %v573_v47, 2 }
 0x1d7   : > { %v569_v50 = vmax.f32 %v567_v46, %v568_v48 }
 0x1d8   : > { %v575_v51 = vmax.f32 %v573_v47, %v574_v49 }
 0x1d9   : > { %v570_v52 = vrot.slane %v569_v50, 1 }
 0x1da   : > { %v576_v53 = vrot.slane %v575_v51, 1 }
 0x1db   : > { %v571_v54 = vmax.f32 %v569_v50, %v570_v52  ;;  %v1104_v50 = vld [vmem:[%s1345_s8] sm:$0xff]   ;;  %v890_v52 = vpop.permute.xlu0 %889 }
 0x1dc   : > { %v577_v55 = vmax.f32 %v575_v51, %v576_v53  ;;  %v1105_v51 = vld [vmem:[%s1345_s8 + $0x8] sm:$0xff]  }
 0x1dd   : > { %v578_v56 = vsub.f32 %v560_v39, %v571_v54 }
 0x1de   : > { %v579_v57 = vsub.f32 %v562_v41, %v577_v55 }
 0x1df   : > { %v580_v58 = vmul.f32 1.442695, %v578_v56  ;;  %v895_v53 = vpop.permute.xlu0 %894 }
 0x1e0   : > { %v582_v59 = vmul.f32 1.442695, %v579_v57 }
 0x1e1   : > { %1106 = vpow2.f32 %v580_v58 }
 0x1e2   : > { %1108 = vpow2.f32 %v582_v59 }
 0x1eb   : > { %v1107_v60 = vpop.eup %1106 }
 0x1ec   : > { %v1109_v61 = vpop.eup %1108  ;;  %v584_v62 = vrot.slane %v1107_v60, 4 }
 0x1ed   : > { %v590_v63 = vrot.slane %v1109_v61, 4 }
 0x1ee   : > { %v585_v1 = vadd.f32 %v1107_v60, %v584_v62 }
 0x1ef   : > { %v591_v2 = vadd.f32 %v1109_v61, %v590_v63  ;;  %v900_v63 = vpop.permute.xlu0 %899 }
 0x1f0   : > { %v586_v3 = vrot.slane %v585_v1, 2 }
 0x1f1   : > { %v592_v7 = vrot.slane %v591_v2, 2 }
 0x1f2   : > { %v587_v11 = vadd.f32 %v586_v3, %v585_v1 }
 0x1f3   : > { %v593_v12 = vadd.f32 %v592_v7, %v591_v2 }
 0x1f4   : > { %v588_v15 = vrot.slane %v587_v11, 1 }
 0x1f5   : > { %v594_v16 = vrot.slane %v593_v12, 1 }
 0x1f6   : > { %v589_v17 = vadd.f32 %v588_v15, %v587_v11 }
 0x1f7   : > { %v595_v18 = vadd.f32 %v594_v16, %v593_v12 }
 0x1f8   : > { %1110 = vrcp.f32 %v589_v17 }
 0x1f9   : > { %1112 = vrcp.f32 %v595_v18 }
 0x202   : > { %v1111_v19 = vpop.eup %1110 }
 0x203   : > { %v1113_v20 = vpop.eup %1112  ;;  %v598_v21 = vmul.f32 %v1111_v19, %v1107_v60  ;;  %v905_v19 = vpop.permute.xlu0 %904 }
 0x204   : > { %v599_v22 = vmul.f32 %v1113_v20, %v1109_v61 }
 0x205   : > { %v600_v23 = vpack.c.bf16 %v598_v21, %v598_v21 }
 0x206   : > { %v601_v24 = vpack.c.bf16 %v599_v22, %v599_v22 }
 0x207   : > { %v624_v25 = vsel %vm622_vm2, %v600_v23, 0 }
 0x208   : > { %1056 = vmatprep.subr.msk.bf16.mxu1 %vm622_vm2, %v601_v24 }
 0x209   : > { %630 = vmatpush1.bf16.msra.mxu1 %v624_v25 }
 0x20c   : > { %1057 = vmatmul.mubr.msk.bf16.vlgmr.msra.gmra.mrb[4].mxu1 %vm618_vm3, %v610_v26 }
 0x20d   : > { %854 = vmatprep.mubr.bf16.mxu1 %v1138_v0 }
 0x2df   : > { %v663_v27 = vpop.f32.mrb[4].mxu1 }
 0x2e0   : > { %v665_v28 = vpop.f32.mrb[5].mxu1 }
 0x2e1   : > { %v667_v29 = vpop.f32.mrb[6].mxu1 }
 0x2e2   : > { %v674_v30 = vpack.c.bf16 %v667_v29, %v663_v27  ;;  %v669_v31 = vpop.f32.mrb[7].mxu1 }
 0x2e3   : > { %v675_v32 = vpack.c.bf16 %v669_v31, %v665_v28 }
 0x2e5   : > { %737 = vmatprep.subr.bf16.mxu0 %v675_v32 }
 0x2e6   : > { %738 = vmatpush1.bf16.msra.mxu0 %v674_v30 }
 0x2e9   : > { %1061 = vmatmul.mubr.msk.bf16.vlgmr.msra.gmra.mrb[4].mxu0 %vm521_vm1, %v1103_v33 }
 0x3bc   : > { %v771_v35 = vpop.f32.mrb[4].mxu0 }
 0x3bd   : > { %v792_v36 = vadd.f32 %v785_v34, %v771_v35  ;;  %v773_v37 = vpop.f32.mrb[5].mxu0 }
 0x3be   : > { %v793_v39 = vadd.f32 %v785_v34, %v773_v37  ;;  %v775_v40 = vpop.f32.mrb[6].mxu0 }
 0x3bf   : > { %v794_v41 = vadd.f32 %v790_v38, %v775_v40  ;;  %v777_v42 = vpop.f32.mrb[7].mxu0  ;;  %v796_v44 = vmax.f32 %v792_v36, 0.0 }
 0x3c0   : > { %v795_v43 = vadd.f32 %v790_v38, %v777_v42  ;;  %v797_v46 = vmax.f32 %v793_v39, 0.0 }
 0x3c1   : > { %v798_v45 = vmax.f32 %v794_v41, 0.0 }
 0x3c2   : > { %v799_v47 = vmax.f32 %v795_v43, 0.0 }
 0x3c3   : > { %v804_v48 = vpack.c.bf16 %v798_v45, %v796_v44 }
 0x3c4   : > { %v805_v49 = vpack.c.bf16 %v799_v47, %v797_v46 }
 0x3c6   : > { %822 = vmatprep.subr.bf16.mxu1 %v805_v49 }
 0x3c7   : > { %823 = vmatpush1.bf16.msra.mxu1 %v804_v48 }
 0x3ca   : > { %1064 = vmatmul.mubr.msk.bf16.vlgmr.msra.gmra.mrb[8].mxu1 %vm521_vm1, %v1104_v50 }
 0x3cb   : > { %864 = vmatprep.mubr.bf16.mxu1 %v1138_v0 }
 0x3d2   : > { %1065 = vmatmul.mubr.msk.bf16.gmra.mrb[12].mxu1 %vm521_vm1, %v1105_v51 }
 0x49d   : > { %v856_v54 = vpop.f32.mrb[8].mxu1 }
 0x49e   : > { %v875_v55 = vadd.f32 %v856_v54, %v1237_v6  ;;  %v858_v56 = vpop.f32.mrb[9].mxu1 }
 0x49f   : > { %v876_v57 = vadd.f32 %v858_v56, %v1233_v4  ;;  %v860_v58 = vpop.f32.mrb[10].mxu1 }
 0x4a0   : > { %v907_v59 = vadd.f32 %v890_v52, %v875_v55  ;;  %v877_v60 = vadd.f32 %v860_v58, %v1241_v8  ;;  %v862_v61 = vpop.f32.mrb[11].mxu1 }
 0x4a1   : > { %v908_v0 = vadd.f32 %v890_v52, %v876_v57  ;;  %v878_v6 = vadd.f32 %v862_v61, %v1235_v5 }
 0x4a2   : > { %v915_v62 = vmax.f32 %v907_v59, 0.0  ;;  %v909_v4 = vadd.f32 %v895_v53, %v877_v60 }
 0x4a3   : > { %v916_v1 = vmax.f32 %v908_v0, 0.0  ;;  %v910_v2 = vadd.f32 %v895_v53, %v878_v6 }
 0x4a4   : > { %923 = vst [vmem:[%s1313_s27] sm:$0xff] %v915_v62  ;;  %v917_v8 = vmax.f32 %v909_v4, 0.0 }
 0x4a5   : > { %924 = vst [vmem:[%s1313_s27 + $0x8] sm:$0xff] %v916_v1  ;;  %v918_v3 = vmax.f32 %v910_v2, 0.0  ;;  %v866_v7 = vpop.f32.mrb[12].mxu1 }
 0x4a6   : > { %925 = vst [vmem:[%s1313_s27 + $0x10] sm:$0xff] %v917_v8  ;;  %v879_v11 = vadd.f32 %v866_v7, %v1251_v13  ;;  %v868_v12 = vpop.f32.mrb[13].mxu1 }
 0x4a7   : > { %926 = vst [vmem:[%s1313_s27 + $0x18] sm:$0xff] %v918_v3  ;;  %v880_v15 = vadd.f32 %v868_v12, %v1243_v9  ;;  %v870_v5 = vpop.f32.mrb[14].mxu1 }
 0x4a8   : > { %v911_v16 = vadd.f32 %v900_v63, %v879_v11  ;;  %v881_v17 = vadd.f32 %v870_v5, %v1253_v14  ;;  %v872_v18 = vpop.f32.mrb[15].mxu1 }
 0x4a9   : > { %v912_v20 = vadd.f32 %v900_v63, %v880_v15  ;;  %v882_v21 = vadd.f32 %v872_v18, %v1245_v10 }
 0x4aa   : > { %v919_v22 = vmax.f32 %v911_v16, 0.0  ;;  %v913_v23 = vadd.f32 %v905_v19, %v881_v17 }
 0x4ab   : > { %v920_v24 = vmax.f32 %v912_v20, 0.0  ;;  %v914_v13 = vadd.f32 %v905_v19, %v882_v21 }
 0x4ac   : > { %927 = vst [vmem:[%s1313_s27 + $0x20] sm:$0xff] %v919_v22  ;;  %v921_v25 = vmax.f32 %v913_v23, 0.0 }
 0x4ad   : > { %928 = vst [vmem:[%s1313_s27 + $0x28] sm:$0xff] %v920_v24  ;;  %v922_v26 = vmax.f32 %v914_v13, 0.0 }
 0x4ae   : > { %929 = vst [vmem:[%s1313_s27 + $0x30] sm:$0xff] %v921_v25 }
 0x4af   : > { %930 = vst [vmem:[%s1313_s27 + $0x38] sm:$0xff] %v922_v26 }
 0x4b0 PF: > { %s20_s15 = sadd.s32 1, %s1136_s15   ;;  %s1348_s13 = smov %s1132_s14 }
 0x4b1   : > { %p17_p5 = scmp.ge.s32.totalorder %s20_s15, 4   ;;  %s1349_s14 = smov %s1351_s16 }
 0x4b3   :  { %19 = sbr.rel (!%p17_p5) target bundleno = 2 (0x2), region = 96 }

</bundles_post_ra>
